<compile_context>
chip_gen: v6e
topology: v6e:2x2x1
jax: 0.10.0
libtpu: 0.0.40
codegen_flags: <defaults>
</compile_context>

<pallas_src>
import functools

import jax
import jax.numpy as jnp
from jax.experimental import pallas as pl
from jax.experimental.pallas import tpu as pltpu


def _probe_pipeline_mode():
    """Does this JAX support pipeline_mode=pl.Buffered(k) on BlockSpec?"""
    try:
        pl.BlockSpec((8, 128), lambda i: (0, 0), pipeline_mode=pl.Buffered(1))
        return True
    except TypeError:
        return False


_HAS_PIPELINE_MODE = _probe_pipeline_mode()


def hypernet_kernel(x_ref, w1_ref, b1_ref, w2_ref, b2_ref, o_ref, *, mxu_dtype):
    """One row-tile of x; full weight matrices resident in VMEM."""
    x = x_ref[...]                                   # (tm, dim)
    xm = x if x.dtype == mxu_dtype else x.astype(mxu_dtype)

    # linear1: (tm, dim) @ (dim, hid) -> f32 accumulation, f32 bias add.
    h = jnp.dot(xm, w1_ref[...], preferred_element_type=jnp.float32)
    h = h + b1_ref[...]                              # (tm, hid) f32

    # linear2: (tm, hid) @ (hid, dim) -> f32 accumulation, f32 bias add.
    y = jnp.dot(h.astype(mxu_dtype), w2_ref[...],
                preferred_element_type=jnp.float32)
    y = y + b2_ref[...]                              # (tm, dim) f32

    # Residual in f32; single cast at the store.
    o_ref[...] = (x.astype(jnp.float32) + y).astype(o_ref.dtype)


def _const_spec(shape):
    """BlockSpec for a grid-invariant (resident) operand, single-buffered."""
    index_map = lambda i: (0, 0)
    if _HAS_PIPELINE_MODE:
        return pl.BlockSpec(shape, index_map, pipeline_mode=pl.Buffered(1))
    return pl.BlockSpec(shape, index_map)   # older jax: default double-buffering


def _choose_tm(n_rows, tm_max, min_steps=4):
    """Row tile: multiple of 8, <= tm_max, >= min_steps grid steps when
    possible, preferring a tm that divides n_rows (unmasked stores)."""
    tm_max = max(8, (int(tm_max) // 8) * 8)          # validate multiple of 8
    if n_rows <= 8:
        return n_rows                                # single full-extent block
    tm = min(tm_max, max(8, ((n_rows // min_steps) // 8) * 8))
    if n_rows % tm != 0:
        for cand in range(tm, 7, -8):                # nearest divisor, if any
            if n_rows % cand == 0:
                return cand
    return tm


def _vmem_need_bytes(tm, dim, hid, x_bytes, w_bytes, out_bytes, weight_bufs):
    return (2 * tm * dim * x_bytes                   # x tiles (double-buffered)
            + 2 * tm * dim * out_bytes               # out tiles (double-buffered)
            + weight_bufs * 2 * dim * hid * w_bytes  # resident W1 + W2
            + (hid + dim) * 4                        # biases (f32)
            + tm * hid * 4 + tm * dim * 4)           # h, y f32 temporaries


def prepare_params(w1, b1, w2, b2, *, use_bf16=True):
    """One-time parameter prep (call once, NOT per forward): pre-transposed
    [in, out] weights cast to the kernel dtype, biases as f32 row vectors."""
    w_dtype = jnp.bfloat16 if use_bf16 else jnp.float32
    dim, hid = w1.shape
    return (w1.astype(w_dtype),
            b1.reshape(1, hid).astype(jnp.float32),
            w2.astype(w_dtype),
            b2.reshape(1, dim).astype(jnp.float32))


@functools.partial(jax.jit, static_argnames=("tm_max", "out_dtype"))
def hypernetwork_forward(x, w1, b1, w2, b2, *, tm_max=512, out_dtype=None):
    """x: [N, dim].  w1: [dim, 2*dim], b1: [2*dim], w2: [2*dim, dim], b2: [dim]
    (use prepare_params once to cast weights; bf16 weights select the bf16-MXU
    fast path, f32 weights give full-f32 parity).  Best throughput when dim is
    a multiple of 128 (lane-dense stores)."""
    N, dim = x.shape
    hid = w1.shape[1]
    out_dtype = x.dtype if out_dtype is None else out_dtype
    mxu_dtype = w1.dtype

    b1r = b1.reshape(1, hid).astype(jnp.float32)
    b2r = b2.reshape(1, dim).astype(jnp.float32)

    # VMEM budget from actual per-core capacity (v5e/v6e 128 MiB, v7x 64 MiB).
    try:
        vmem_cap = pltpu.get_tpu_info().vmem_capacity_bytes
    except Exception:
        vmem_cap = 64 * 1024 * 1024                  # conservative fallback
    budget = int(vmem_cap * 0.45)

    x_bytes = jnp.dtype(x.dtype).itemsize
    w_bytes = jnp.dtype(mxu_dtype).itemsize
    o_bytes = jnp.dtype(out_dtype).itemsize
    weight_bufs = 1 if _HAS_PIPELINE_MODE else 2

    tm = _choose_tm(N, tm_max)
    # Shrink the row tile if one grid step's footprint would not fit the budget.
    while tm > 8 and _vmem_need_bytes(tm, dim, hid, x_bytes, w_bytes, o_bytes,
                                      weight_bufs) > budget:
        tm = max(8, ((tm // 2) // 8) * 8)
    # TODO(synk): if the resident bf16 weights alone exceed the budget (very
    # large dim), stream weight column tiles via a hid grid axis instead.

    need = _vmem_need_bytes(tm, dim, hid, x_bytes, w_bytes, o_bytes, weight_bufs)
    vmem_limit = int(min(max(2 * need, 16 * 1024 * 1024), budget + need))
    vmem_limit = max(need, min(vmem_limit, int(vmem_cap * 0.75)))

    grid = (pl.cdiv(N, tm),)

    cost = pl.CostEstimate(
        flops=4 * N * dim * hid,                      # two GEMMs
        transcendentals=0,
        bytes_accessed=(N * dim * (x_bytes + o_bytes)
                        + 2 * dim * hid * w_bytes + (hid + dim) * 4))

    kernel = functools.partial(hypernet_kernel, mxu_dtype=mxu_dtype)

    return pl.pallas_call(
        kernel,
        out_shape=jax.ShapeDtypeStruct((N, dim), out_dtype),
        grid_spec=pltpu.PrefetchScalarGridSpec(
            num_scalar_prefetch=0,
            grid=grid,
            in_specs=[
                pl.BlockSpec((tm, dim), lambda i: (i, 0)),   # x row-tile
                _const_spec((dim, hid)),                     # W1^T (resident)
                _const_spec((1, hid)),                       # b1   (f32)
                _const_spec((hid, dim)),                     # W2^T (resident)
                _const_spec((1, dim)),                       # b2   (f32)
            ],
            out_specs=pl.BlockSpec((tm, dim), lambda i: (i, 0)),
        ),
        compiler_params=pltpu.CompilerParams(
            dimension_semantics=("parallel",),
            vmem_limit_bytes=vmem_limit),
        cost_estimate=cost,
    )(x, w1, b1r, w2, b2r)


def reference_forward(x, w1, b1, w2, b2):
    h = x @ w1 + b1
    return x + (h @ w2 + b2)


if __name__ == "__main__":
    # Small, lane-dense hypernetwork dim (multiple of 128); N chosen so the
    # default tm gives a 4-step grid (>= 2 steps per v7x TensorCore).
    dim = 128
    N = 512

    key = jax.random.PRNGKey(0)
    kx, k1, kb1, k2, kb2 = jax.random.split(key, 5)

    # Deterministic synthetic parameters (PyTorch Linear-style uniform init),
    # stored pre-transposed as [in, out].
    bound1 = 1.0 / jnp.sqrt(dim)
    bound2 = 1.0 / jnp.sqrt(2 * dim)
    w1 = jax.random.uniform(k1, (dim, 2 * dim), jnp.float32, -bound1, bound1)
    b1 = jax.random.uniform(kb1, (2 * dim,), jnp.float32, -bound1, bound1)
    w2 = jax.random.uniform(k2, (2 * dim, dim), jnp.float32, -bound2, bound2)
    b2 = jax.random.uniform(kb2, (dim,), jnp.float32, -bound2, bound2)

    x = jax.random.normal(kx, (N, dim), jnp.float32)
    ref = reference_forward(x, w1, b1, w2, b2)

    # Fast path: one-time bf16 weight prep, bf16 MXU operands, f32 accumulate.
    params_bf16 = prepare_params(w1, b1, w2, b2, use_bf16=True)
    out = jax.block_until_ready(hypernetwork_forward(x, *params_bf16))
    assert out.shape == (N, dim) and out.dtype == x.dtype
    err = float(jnp.max(jnp.abs(out - ref)))
    assert jnp.allclose(out, ref, atol=5e-2, rtol=5e-2), f"bf16 path mismatch (max abs err {err})"

    # f32 parity path: f32 weights -> full-f32 MXU, tight tolerance.
    params_f32 = prepare_params(w1, b1, w2, b2, use_bf16=False)
    out32 = jax.block_until_ready(hypernetwork_forward(x, *params_f32))
    err32 = float(jnp.max(jnp.abs(out32 - ref)))
    assert jnp.allclose(out32, ref, atol=1e-4, rtol=1e-4), f"f32 path mismatch (max abs err {err32})"

    print("KERNEL_OK")
</pallas_src>

<mosaic_0001>
module attributes {stable_mosaic.version = 11 : i64} {
  func.func @hypernet_kernel(%arg0: i32, %arg1: memref<128x128xf32, #tpu.memory_space<vmem>>, %arg2: memref<128x256xbf16, #tpu.memory_space<vmem>>, %arg3: memref<1x256xf32, #tpu.memory_space<vmem>>, %arg4: memref<256x128xbf16, #tpu.memory_space<vmem>>, %arg5: memref<1x128xf32, #tpu.memory_space<vmem>>, %arg6: memref<128x128xf32, #tpu.memory_space<vmem>>) attributes {dimension_semantics = [#tpu.dimension_semantics<parallel>], iteration_bounds = array<i64: 4>, scalar_prefetch = 0 : i64, scratch_operands = 0 : i64, tpu.core_type = #tpu.core_type<tc>, window_params = [{transform_indices = @transform_0, window_bounds = array<i64: 128, 128>}, {pipeline_mode = #tpu.pipeline_mode<synchronous>, transform_indices = @transform_1, window_bounds = array<i64: 128, 256>}, {pipeline_mode = #tpu.pipeline_mode<synchronous>, transform_indices = @transform_2, window_bounds = array<i64: 1, 256>}, {pipeline_mode = #tpu.pipeline_mode<synchronous>, transform_indices = @transform_3, window_bounds = array<i64: 256, 128>}, {pipeline_mode = #tpu.pipeline_mode<synchronous>, transform_indices = @transform_4, window_bounds = array<i64: 1, 128>}, {transform_indices = @transform_5, window_bounds = array<i64: 128, 128>}]} {
    %c0 = arith.constant 0 : index
    %c0_0 = arith.constant 0 : index
    %0 = vector.load %arg1[%c0, %c0_0] : memref<128x128xf32, #tpu.memory_space<vmem>>, vector<128x128xf32>
    %1 = arith.truncf %0 : vector<128x128xf32> to vector<128x128xbf16>
    %c0_1 = arith.constant 0 : index
    %c0_2 = arith.constant 0 : index
    %2 = vector.load %arg2[%c0_1, %c0_2] : memref<128x256xbf16, #tpu.memory_space<vmem>>, vector<128x256xbf16>
    %cst = arith.constant dense<0.000000e+00> : vector<128x256xf32>
    %3 = tpu.matmul %1, %2, %cst {dimension_numbers = #tpu.dot_dimension_numbers<[1], [0], [0], [1], [0, 0, 1, 1], [], []>} : vector<128x128xbf16>, vector<128x256xbf16>, vector<128x256xf32> -> vector<128x256xf32>
    %c0_3 = arith.constant 0 : index
    %c0_4 = arith.constant 0 : index
    %4 = vector.load %arg3[%c0_3, %c0_4] : memref<1x256xf32, #tpu.memory_space<vmem>>, vector<1x256xf32>
    %5 = vector.broadcast %4 : vector<1x256xf32> to vector<128x256xf32>
    %6 = arith.addf %3, %5 : vector<128x256xf32>
    %7 = arith.truncf %6 : vector<128x256xf32> to vector<128x256xbf16>
    %c0_5 = arith.constant 0 : index
    %c0_6 = arith.constant 0 : index
    %8 = vector.load %arg4[%c0_5, %c0_6] : memref<256x128xbf16, #tpu.memory_space<vmem>>, vector<256x128xbf16>
    %cst_7 = arith.constant dense<0.000000e+00> : vector<128x128xf32>
    %9 = tpu.matmul %7, %8, %cst_7 {dimension_numbers = #tpu.dot_dimension_numbers<[1], [0], [0], [1], [0, 0, 1, 1], [], []>} : vector<128x256xbf16>, vector<256x128xbf16>, vector<128x128xf32> -> vector<128x128xf32>
    %c0_8 = arith.constant 0 : index
    %c0_9 = arith.constant 0 : index
    %10 = vector.load %arg5[%c0_8, %c0_9] : memref<1x128xf32, #tpu.memory_space<vmem>>, vector<1x128xf32>
    %11 = vector.broadcast %10 : vector<1x128xf32> to vector<128x128xf32>
    %12 = arith.addf %9, %11 : vector<128x128xf32>
    %13 = arith.addf %0, %12 : vector<128x128xf32>
    %c0_10 = arith.constant 0 : index
    %c0_11 = arith.constant 0 : index
    %14 = vector.load %arg6[%c0_10, %c0_11] : memref<128x128xf32, #tpu.memory_space<vmem>>, vector<128x128xf32>
    tpu.vector_store %arg6[%c0_10, %c0_11], %13 {strides = array<i32>} : memref<128x128xf32, #tpu.memory_space<vmem>>, vector<128x128xf32>,
    return
  }
  func.func @transform_0(%arg0: i32) -> (i32, i32) {
    %c0_i32 = arith.constant 0 : i32
    %c0_i32_0 = arith.constant 0 : i32
    return %arg0, %c0_i32 : i32, i32
  }
  func.func @transform_1(%arg0: i32) -> (i32, i32) {
    %c0_i32 = arith.constant 0 : i32
    %c0_i32_0 = arith.constant 0 : i32
    %c0_i32_1 = arith.constant 0 : i32
    return %c0_i32, %c0_i32_0 : i32, i32
  }
  func.func @transform_2(%arg0: i32) -> (i32, i32) {
    %c0_i32 = arith.constant 0 : i32
    %c0_i32_0 = arith.constant 0 : i32
    %c0_i32_1 = arith.constant 0 : i32
    return %c0_i32, %c0_i32_0 : i32, i32
  }
  func.func @transform_3(%arg0: i32) -> (i32, i32) {
    %c0_i32 = arith.constant 0 : i32
    %c0_i32_0 = arith.constant 0 : i32
    %c0_i32_1 = arith.constant 0 : i32
    return %c0_i32, %c0_i32_0 : i32, i32
  }
  func.func @transform_4(%arg0: i32) -> (i32, i32) {
    %c0_i32 = arith.constant 0 : i32
    %c0_i32_0 = arith.constant 0 : i32
    %c0_i32_1 = arith.constant 0 : i32
    return %c0_i32, %c0_i32_0 : i32, i32
  }
  func.func @transform_5(%arg0: i32) -> (i32, i32) {
    %c0_i32 = arith.constant 0 : i32
    %c0_i32_0 = arith.constant 0 : i32
    return %arg0, %c0_i32 : i32, i32
  }
}

</mosaic_0001>

<bundles_post_ra>
// kernel: hypernetwork_forward.1
= control target key start
LH: loop header
LB: loop body
LE: loop exit
PB: predicated region body
PF: predicated region fallthrough
CT: control target
= control target key end

     0   :  { %10 = vsyncpa [#allocation3], 0  ;;  %s1693_s0 = inlined_call_operand.hbm [shape: f32[512,128], index: 0, kind: input, shape index: {}]   ;;  %s1694_s1 = inlined_call_operand.hbm [shape: bf16[128,256], index: 1, kind: input, shape index: {}]   ;;  %s1695_s2 = inlined_call_operand.vmem [shape: f32[1,256], index: 2, kind: input, shape index: {}]   ;;  %s1696_s3 = inlined_call_operand.hbm [shape: bf16[256,128], index: 3, kind: input, shape index: {}]   ;;  %s1697_s4 = inlined_call_operand.vmem [shape: f32[1,128], index: 4, kind: input, shape index: {}]   ;;  %s1698_s5 = inlined_call_operand.hbm [shape: f32[512,128], index: 5, kind: output, shape index: {}]  }
   0x1   :  { %12 = vsyncpa [#allocation3 + $0x1], 0 }
   0x2   :  { %13 = vsyncpa [#allocation6], 0 }
   0x3   :  { %14 = vsyncpa [#allocation4], 0 }
   0x4   :  { %16 = vsyncpa [#allocation4 + $0x1], 0  ;;  %s1328_s18 = smov 0   ;;  %s1330_s19 = smov 0  }
   0x5   :  { %s1332_s20 = smov 0   ;;  %s1334_s21 = smov 0  }
   0x6 LB: > { %s1349_s22 = sadd.s32 4294967295, %s1285_s21   ;;  %s906_s23 = sadd.s32 4294967294, %s1285_s21   ;;  %s1285_s21 = sphi %s1334_s21, %s1720_s21   ;;  %s1281_s20 = sphi %s1332_s20, %s1719_s20   ;;  %s1277_s19 = sphi %s1330_s19, %s1718_s19   ;;  %s1273_s18 = sphi %s1328_s18, %s1717_s18  }
   0x7   : > { %p42_p0 = scmp.ne.s32.totalorder %s1277_s19, %s1273_s18  ;;  %p1699_p1 = scmp.eq.s32.totalorder %s1349_s22, 0 }
   0x8   : > { %p150_p2 = scmp.eq.s32.totalorder %s1349_s22, 3  ;;  %p156_p3 = scmp.eq.s32.totalorder %s906_s23, 3 }
   0x9   : > { %p1358_p4 = por %p1699_p1, %p42_p0  ;;  %p907_p5 = scmp.ge.s32.totalorder %s1285_s21, 1 }
   0xa   : > { %p1363_p6 = por %p156_p3, %p42_p0  ;;  %p163_p7 = scmp.lt.s32.totalorder %s1285_s21, 5 }
   0xb   : > { %s1704_s24 = scalar_select %p1358_p4, 1, 0 }
   0xc   : > { %s1705_s25 = scalar_select %p1363_p6, 1, 0 }
   0xd   : > { %p1368_p8 = pnand %p907_p5, %p163_p7  ;;  %s1287_s27 = smov [#allocation5]  }
   0xe   : > { %s175_s28 = sshll.u32 %s1287_s27, 4  ;;  %s1288_s30 = smov [#allocation7]   ;;  %s176_s28 = int_to_ptr.vmem [resolvable:$true] %s175_s28 }
   0xf   : > { %s1706_s26 = scalar_select %p1368_p8, 1, 0 }
  0x10   : > { %p1035_p9 = pneg %p1368_p8  ;;  %s191_s6 = sshll.u32 %s1288_s30, 4  ;;  %s192_s6 = int_to_ptr.vmem [resolvable:$true] %s191_s6 }
  0x11   : > { %s1148_s7 = scalar_lea.vmem %s176_s28, 2048  ;;  %p1156_p3 = scmp.lt.s32.totalorder %s176_s28, %s176_s28 }
  0x12   : > { %p1376_p10 = pnand %p1035_p9, %p1699_p1  ;;  %p1149_p12 = scmp.ne.s32.totalorder %s176_s28, %s1148_s7 }
  0x13   : > { %p1157_p5 = scmp.lt.s32.totalorder %s1148_s7, %s1148_s7 }
  0x14   : > { %p1139_p11 = pneg %p1376_p10 }
  0x15   : > { %p1158_p7 = por %p1157_p5, %p1156_p3 }
  0x16   : > { %p1151_p13 = pnand %p1149_p12, %p1139_p11 }
  0x18   : > { %p1152_p0 = pneg %p1151_p13 }
  0x1a   : > { %p1159_p9 = pnand %p1158_p7, %p1152_p0 }
  0x1c   : > { %1162 = shalt.err (!%p1159_p9)
}
  0x1d   : > { %s1700_s8 = smov 128   ;;  %s1290_s9 = smov 8  }
  0x1e   : > { %1038 = dma.hbm_to_vmem [thread:$0]  (!%p1376_p10), %s1694_s1, 2048, %s176_s28, [#allocation6], %s1700_s8, %s1700_s8, %s1290_s9  }
  0x1f   : > { %s1174_s12 = scalar_lea.vmem %s192_s6, 2048  ;;  %p1182_p0 = scmp.lt.s32.totalorder %s192_s6, %s192_s6 }
  0x20   : > { %p1175_p12 = scmp.ne.s32.totalorder %s192_s6, %s1174_s12  ;;  %p1183_p5 = scmp.lt.s32.totalorder %s1174_s12, %s1174_s12 }
  0x22   : > { %p1177_p13 = pnand %p1175_p12, %p1139_p11  ;;  %p1184_p7 = por %p1183_p5, %p1182_p0 }
  0x24   : > { %p1178_p3 = pneg %p1177_p13 }
  0x26   : > { %p1185_p9 = pnand %p1184_p7, %p1178_p3 }
  0x28   : > { %1188 = shalt.err (!%p1185_p9)
}
  0x29   : > { %s1291_s13 = smov 64   ;;  %s1292_s14 = smov 4  }
  0x2a   : > { %1041 = dma.hbm_to_vmem [thread:$0]  (!%p1376_p10), %s1696_s3, 2048, %s192_s6, [#allocation6], %s1291_s13, %s1291_s13, %s1292_s14  }
  0x2b   : > { %s1402_s17 = sadd.s32 1, %s1285_s21   ;;  %s29_s27 = sadd.s32 1, %s1281_s20 }
  0x2c   : > { %s26_s23 = ssub.s32 %s1285_s21, %s1402_s17  ;;  %p36_p12 = scmp.ne.s32.totalorder %s1281_s20, %s1277_s19 }
  0x2d   : > { %p27_p11 = scmp.eq.s32.totalorder %s26_s23, 0  ;;  %p37_p13 = scmp.eq.s32.totalorder %s1285_s21, 0 }
  0x2e   : > { %p1415_p0 = por %p150_p2, %p36_p12  ;;  %p1052_p5 = scmp.lt.s32.totalorder %s1285_s21, 4 }
  0x2f   : > { %s1411_s28 = scalar_select %p27_p11, %s1281_s20, %s29_s27  }
  0x30   : > { %p38_p3 = por %p37_p13, %p36_p12  ;;  %s208_s29 = sand.u32 1, %s1281_s20  }
  0x31   : > { %s1708_s30 = scalar_select %p1415_p0, 1, 0 }
  0x32   : > { %s911_s7 = sshll.u32 %s208_s29, 7  ;;  %s957_s6 = sshll.u32 %s1285_s21, 11 }
  0x33   : > { %s1425_s12 = scalar_lea.hbm %s1693_s0, %s957_s6  ;;  %s212_s13 = scalar_lea.vmem [#allocation2], %s911_s7 }
  0x34   : > { %s219_s14 = sshll.u32 %s212_s13, 4  ;;  %p1429_p2 = pnand %p1052_p5, %p38_p3  ;;  %s1427_s14 = int_to_ptr.vmem [resolvable:$true] %s219_s14 }
  0x35   : > { %s1433_s16 = scalar_lea.sflag [#allocation3], %s208_s29  ;;  %s1189_s23 = scalar_lea.hbm %s1425_s12, 2048 }
  0x36   : > { %p1190_p10 = scmp.ne.s32.totalorder %s1425_s12, %s1189_s23  ;;  %p1191_p7 = pneg %p1429_p2 }
  0x37   : > { %s1194_s7 = scalar_lea.hbm %s1693_s0, 8192  ;;  %p1195_p12 = scmp.lt.s32.totalorder %s1425_s12, %s1693_s0 }
  0x38   : > { %p1192_p9 = pnand %p1191_p7, %p1190_p10  ;;  %p1196_p13 = scmp.lt.s32.totalorder %s1194_s7, %s1189_s23 }
  0x3a   : > { %p1193_p11 = pneg %p1192_p9  ;;  %p1197_p3 = por %p1196_p13, %p1195_p12 }
  0x3c   : > { %p1198_p5 = pnand %p1197_p3, %p1193_p11 }
  0x3e   : > { %1201 = shalt.err (!%p1198_p5)
}
  0x3f   : > { %s1202_s29 = scalar_lea.vmem %s1427_s14, 2048  ;;  %s1293_s13 = smov [#allocation2]  }
  0x40   : > { %p1203_p1 = scmp.ne.s32.totalorder %s1427_s14, %s1202_s29  ;;  %s1207_s8 = sshll.u32 %s1293_s13, 4  ;;  %s1208_s8 = int_to_ptr.vmem [resolvable:$false] %s1207_s8 }
  0x41   : > { %s1209_s27 = scalar_lea.vmem %s1208_s8, 4096  ;;  %p1210_p9 = scmp.lt.s32.totalorder %s1427_s14, %s1208_s8 }
  0x42   : > { %p1205_p6 = pnand %p1203_p1, %p1191_p7  ;;  %p1211_p0 = scmp.lt.s32.totalorder %s1209_s27, %s1202_s29 }
  0x44   : > { %p1206_p10 = pneg %p1205_p6  ;;  %p1212_p4 = por %p1211_p0, %p1210_p9 }
  0x46   : > { %p1213_p8 = pnand %p1212_p4, %p1206_p10 }
  0x48   : > { %1216 = shalt.err (!%p1213_p8)
}
  0x49   : > { %s1710_s23 = smov 128   ;;  %p1711_p1 = scmp.ne.s32.totalorder %s1706_s26, 0 }
  0x4a   : > { %1045 = dma.hbm_to_vmem [thread:$0]  (!%p1429_p2), %s1425_s12, 2048, %s1427_s14, %s1433_s16, %s1710_s23, %s1710_s23, %s1290_s9  }
  0x4b   : > { %231 = sbr.rel (%p1711_p1) target bundleno = 596 (0x254), region = 40  ;;  %s1460_s6 = sand.u32 (!%p1711_p1), 1, %s1277_s19  }
  0x4c   : > { %s915_s8 = sshll.u32 (!%p1711_p1), %s1460_s6, 7  ;;  %s234_s7 = scalar_lea.sflag (!%p1711_p1), [#allocation3], %s1460_s6 }
  0x4d   : > { %s1466_s15 = scalar_lea.vmem (!%p1711_p1), [#allocation2], %s915_s8  ;;  %p1712_p4 = scmp.ne.s32.totalorder (!%p1711_p1), %s1704_s24, 0 }
  0x50   : > { %1260 = dma.done.wait (%p1712_p4), %s234_s7, 2048  }
  0x51   : > { %1262 = vsyncadd (%p1712_p4), %s234_s7, 4294965248  ;;  %p1713_p6 = scmp.eq.s32.totalorder %s1349_s22, 0 }
  0x53   : > { %1264 = dma.done.wait (%p1713_p6), [#allocation6], 4096   ;;  %p1714_p8 = pmov %p1713_p6 }
  0x54   : > { %v1294_v0 = vmov 0   ;;  %v1097_v1 = vld [vmem:[#allocation5 + $0x74] ss:$8 sps:$4 sm:$0xff]   ;;  %v1099_v2 = vld [vmem:[#allocation5 + $0x70] ss:$8 sps:$4 sm:$0xff]   ;;  %v1125_v18 = vld [vmem:[#allocation7 + $0x68] sm:$0xff]   ;;  %v317_v57 = vlaneseq }
  0x55   : > { %1266 = vsyncadd (%p1714_p8), [#allocation6], 4294963200  ;;  %439 = vmatprep.mubr.bf16.mxu0 %v1294_v0  ;;  %407 = vmatprep.subr.bf16.mxu0 %v1097_v1  ;;  %v1100_v3 = vld [vmem:[#allocation5 + $0x64] ss:$8 sps:$4 sm:$0xff]   ;;  %v1102_v4 = vld [vmem:[#allocation5 + $0x60] ss:$8 sps:$4 sm:$0xff]  }
  0x56   : > { %408 = vmatpush1.bf16.msra.mxu0 %v1099_v2  ;;  %v1103_v5 = vld [vmem:[#allocation5 + $0x54] ss:$8 sps:$4 sm:$0xff]   ;;  %v1105_v6 = vld [vmem:[#allocation5 + $0x50] ss:$8 sps:$4 sm:$0xff]   ;;  %v1106_v7 = vld [vmem:[#allocation5 + $0x44] ss:$8 sps:$4 sm:$0xff]  }
  0x57   : > { %409 = vmatprep.subr.bf16.mxu0 %v1100_v3  ;;  %v1108_v8 = vld [vmem:[#allocation5 + $0x40] ss:$8 sps:$4 sm:$0xff]   ;;  %v1109_v9 = vld [vmem:[#allocation5 + $0x34] ss:$8 sps:$4 sm:$0xff]   ;;  %v1111_v10 = vld [vmem:[#allocation5 + $0x30] ss:$8 sps:$4 sm:$0xff]  }
  0x58   : > { %v1112_v11 = vld [vmem:[#allocation5 + $0x24] ss:$8 sps:$4 sm:$0xff]   ;;  %v1121_v12 = vld [vmem:[#allocation7 + $0x78] sm:$0xff]   ;;  %v1114_v13 = vld [vmem:[#allocation5 + $0x20] ss:$8 sps:$4 sm:$0xff]   ;;  %v318_v58 = vshrl.u32 %v317_v57, 7 }
  0x59   : > { %v1122_v14 = vld [vmem:[#allocation7 + $0x38] sm:$0xff]   ;;  %959 = vmatprep.subr.bf16.mxu1 %v1121_v12  ;;  %v1123_v16 = vld [vmem:[#allocation7 + $0x70] sm:$0xff]   ;;  %v1118_v20 = vld [vmem:[#allocation5 + $0x4] ss:$8 sps:$4 sm:$0xff]   ;;  %s1596_s14 = scalar_lea.vmem [#allocation8], %s915_s8  ;;  %s958_s16 = sshll.u32 %s1349_s22, 11 }
  0x5a   : > { %410 = vmatpush1.bf16.msra.mxu0 %v1102_v4  ;;  %v1115_v15 = vld [vmem:[#allocation5 + $0x14] ss:$8 sps:$4 sm:$0xff]   ;;  %960 = vmatpush3.bf16.msra.mxu1 %v1122_v14  ;;  %v1117_v19 = vld [vmem:[#allocation5 + $0x10] ss:$8 sps:$4 sm:$0xff]   ;;  %v1126_v21 = vld [vmem:[#allocation7 + $0x28] sm:$0xff]   ;;  %v323_v59 = vsub.s32 1, %v318_v58  ;;  %s1647_s13 = scalar_lea.hbm %s1698_s5, %s958_s16 }
  0x5b   : > { %411 = vmatprep.subr.bf16.mxu0 %v1103_v5  ;;  %v1124_v17 = vld [vmem:[#allocation7 + $0x30] sm:$0xff]   ;;  %961 = vmatprep.subr.bf16.mxu1 %v1123_v16  ;;  %v1127_v22 = vld [vmem:[#allocation7 + $0x60] sm:$0xff]   ;;  %v1481_v25 = vld [vmem:[%s1466_s15 + $0x8] sm:$0xff]  ;;  %v319_v60 = vsub.s32 0, %v318_v58  ;;  %s814_s10 = sshll.u32 %s1596_s14, 4  ;;  %s801_s27 = scalar_lea.sflag [#allocation4], %s1460_s6  ;;  %s1649_s10 = int_to_ptr.vmem [resolvable:$true] %s814_s10 }
  0x5c   : > { %v1120_v23 = vld [vmem:[#allocation5] ss:$8 sps:$4 sm:$0xff]   ;;  %v1129_v27 = vld [vmem:[#allocation7 + $0x58] sm:$0xff]   ;;  %v1487_v30 = vld [vmem:[%s1466_s15 + $0x10] sm:$0xff]  ;;  %s1217_s23 = scalar_lea.vmem %s1649_s10, 2048  ;;  %p1715_p2 = scmp.ne.s32.totalorder %s1708_s30, 0 }
  0x5d   : > { %v1478_v24 = vld [vmem:[%s1466_s15] sm:$0xff]  ;;  %v1130_v29 = vld [vmem:[#allocation7 + $0x18] sm:$0xff]   ;;  %v1499_v34 = vld [vmem:[%s1466_s15 + $0x28] sm:$0xff]  ;;  %p1218_p0 = scmp.ne.s32.totalorder %s1649_s10, %s1217_s23  ;;  %s1295_s22 = smov [#allocation8]  }
  0x5e   : > { %412 = vmatpush1.bf16.msra.mxu0 %v1105_v6  ;;  %962 = vmatpush3.bf16.msra.mxu1 %v1124_v17  ;;  %v1128_v26 = vld [vmem:[#allocation7 + $0x20] sm:$0xff]   ;;  %v291_v28 = vpack.c.bf16 %v1481_v25, %v1478_v24  ;;  %v1490_v31 = vld [vmem:[%s1466_s15 + $0x18] sm:$0xff]  ;;  %v1505_v36 = vld [vmem:[%s1466_s15 + $0x30] sm:$0xff]  ;;  %s1221_s8 = sshll.u32 %s1295_s22, 4  ;;  %s1222_s8 = int_to_ptr.vmem [resolvable:$false] %s1221_s8 }
  0x5f   : > { %413 = vmatprep.subr.bf16.mxu0 %v1106_v7  ;;  %963 = vmatprep.subr.bf16.mxu1 %v1125_v18  ;;  %v292_v32 = vpack.c.bf16 %v1490_v31, %v1487_v30  ;;  %v1496_v33 = vld [vmem:[%s1466_s15 + $0x20] sm:$0xff]  ;;  %v1508_v37 = vld [vmem:[%s1466_s15 + $0x38] sm:$0xff]  ;;  %v1517_v40 = vld [vmem:[%s1466_s15 + $0x48] sm:$0xff]  ;;  %p1219_p7 = pnand %p1218_p0, %p1715_p2  ;;  %s1223_s7 = scalar_lea.vmem %s1222_s8, 4096 }
  0x60   : > { %v293_v35 = vpack.c.bf16 %v1499_v34, %v1496_v33  ;;  %v294_v38 = vpack.c.bf16 %v1508_v37, %v1505_v36  ;;  %v1514_v39 = vld [vmem:[%s1466_s15 + $0x40] sm:$0xff]  ;;  %v1523_v42 = vld [vmem:[%s1466_s15 + $0x50] sm:$0xff]  ;;  %v1526_v43 = vld [vmem:[%s1466_s15 + $0x58] sm:$0xff]  ;;  %p1224_p12 = scmp.lt.s32.totalorder %s1649_s10, %s1222_s8  ;;  %p1225_p13 = scmp.lt.s32.totalorder %s1223_s7, %s1217_s23 }
  0x61   : > { %v295_v41 = vpack.c.bf16 %v1517_v40, %v1514_v39  ;;  %v296_v44 = vpack.c.bf16 %v1526_v43, %v1523_v42  ;;  %v1532_v45 = vld [vmem:[%s1466_s15 + $0x60] sm:$0xff]  ;;  %v1535_v46 = vld [vmem:[%s1466_s15 + $0x68] sm:$0xff]  ;;  %v1541_v48 = vld [vmem:[%s1466_s15 + $0x70] sm:$0xff]  ;;  %p1220_p11 = pneg %p1219_p7 }
  0x62   : > { %414 = vmatpush1.bf16.msra.mxu0 %v1108_v8  ;;  %964 = vmatpush3.bf16.msra.mxu1 %v1126_v21  ;;  %v297_v47 = vpack.c.bf16 %v1535_v46, %v1532_v45  ;;  %v1544_v49 = vld [vmem:[%s1466_s15 + $0x78] sm:$0xff]  ;;  %v1131_v51 = vld [vmem:[#allocation7 + $0x50] sm:$0xff]   ;;  %v1133_v53 = vld [vmem:[#allocation7 + $0x48] sm:$0xff]   ;;  %p1226_p3 = por %p1225_p13, %p1224_p12 }
  0x63   : > { %415 = vmatprep.subr.bf16.mxu0 %v1109_v9  ;;  %965 = vmatprep.subr.bf16.mxu1 %v1127_v22  ;;  %v298_v50 = vpack.c.bf16 %v1544_v49, %v1541_v48  ;;  %v1132_v52 = vld [vmem:[#allocation7 + $0x10] sm:$0xff]   ;;  %v1134_v54 = vld [vmem:[#allocation7 + $0x8] sm:$0xff]   ;;  %v1135_v55 = vld [vmem:[#allocation7 + $0x40] sm:$0xff]  }
  0x64   : > { %v1136_v56 = vld [vmem:[#allocation7] sm:$0xff]   ;;  %p1227_p5 = pnand %p1226_p3, %p1220_p11 }
  0x65   : > { %v315_v62 = vld [vmem:[%s1695_s2] sm:$0x3] }
  0x66   : > { %416 = vmatpush1.bf16.msra.mxu0 %v1111_v10  ;;  %966 = vmatpush3.bf16.msra.mxu1 %v1128_v26  ;;  %v1553_v1 = vrot.slane %v315_v62, %v319_v60 }
  0x67   : > { %417 = vmatprep.subr.bf16.mxu0 %v1112_v11  ;;  %967 = vmatprep.subr.bf16.mxu1 %v1129_v27 }
  0x6a   : > { %418 = vmatpush1.bf16.msra.mxu0 %v1114_v13  ;;  %968 = vmatpush3.bf16.msra.mxu1 %v1130_v29 }
  0x6b   : > { %419 = vmatprep.subr.bf16.mxu0 %v1115_v15  ;;  %969 = vmatprep.subr.bf16.mxu1 %v1131_v51 }
  0x6e   : > { %420 = vmatpush1.bf16.msra.mxu0 %v1117_v19  ;;  %970 = vmatpush3.bf16.msra.mxu1 %v1132_v52 }
  0x6f   : > { %421 = vmatprep.subr.bf16.mxu0 %v1118_v20  ;;  %971 = vmatprep.subr.bf16.mxu1 %v1133_v53 }
  0x72   : > { %422 = vmatpush1.bf16.msra.mxu0 %v1120_v23  ;;  %972 = vmatpush3.bf16.msra.mxu1 %v1134_v54 }
  0x73   : > { %973 = vmatprep.subr.bf16.mxu1 %v1135_v55 }
  0x75   : > { %440 = vmatmul.mubr.bf16.vlgmr.msra.gmra.mxu0 %v291_v28 }
  0x76   : > { %449 = vmatprep.mubr.bf16.mxu0 %v1294_v0  ;;  %974 = vmatpush3.bf16.msra.mxu1 %v1136_v56 }
  0x7d   : > { %450 = vmatmul.mubr.bf16.gmra.mxu0 %v292_v32 }
  0x7e   : > { %459 = vmatprep.mubr.bf16.mxu0 %v1294_v0 }
  0x85   : > { %460 = vmatmul.mubr.bf16.gmra.mxu0 %v293_v35 }
  0x86   : > { %469 = vmatprep.mubr.bf16.mxu0 %v1294_v0 }
  0x8d   : > { %470 = vmatmul.mubr.bf16.gmra.mxu0 %v294_v38 }
  0x8e   : > { %479 = vmatprep.mubr.bf16.mxu0 %v1294_v0 }
  0x95   : > { %480 = vmatmul.mubr.bf16.gmra.mxu0 %v295_v41 }
  0x96   : > { %489 = vmatprep.mubr.bf16.mxu0 %v1294_v0 }
  0x9d   : > { %490 = vmatmul.mubr.bf16.gmra.mxu0 %v296_v44 }
  0x9e   : > { %499 = vmatprep.mubr.bf16.mxu0 %v1294_v0 }
  0xa5   : > { %500 = vmatmul.mubr.bf16.gmra.mxu0 %v297_v47 }
  0xa6   : > { %509 = vmatprep.mubr.bf16.mxu0 %v1294_v0  ;;  %v1551_v0 = vrot.slane %v315_v62, %v323_v59 }
  0xad   : > { %510 = vmatmul.mubr.bf16.gmra.mxu0 %v298_v50 }
 0x135   : > { %v441_v61 = vpop.f32.mrf.mxu0 }
 0x136   : > { %v442_v7 = vadd.f32 %v441_v61, %v1553_v1 }
 0x137   : > { %v443_v63 = vpop.f32.mrf.mxu0 }
 0x138   : > { %v444_v5 = vadd.f32 %v443_v63, %v1551_v0 }
 0x139   : > { %v445_v2 = vpop.f32.mrf.mxu0 }
 0x13a   : > { %v446_v3 = vadd.f32 %v445_v2, %v1553_v1 }
 0x13b   : > { %v447_v4 = vpop.f32.mrf.mxu0 }
 0x13c   : > { %v448_v6 = vadd.f32 %v447_v4, %v1551_v0  ;;  %v520_v10 = vpack.c.bf16 %v446_v3, %v442_v7 }
 0x13d   : > { %v451_v8 = vpop.f32.mrf.mxu0 }
 0x13e   : > { %v521_v9 = vpack.c.bf16 %v448_v6, %v444_v5  ;;  %v452_v17 = vadd.f32 %v451_v8, %v1553_v1 }
 0x13f   : > { %v453_v11 = vpop.f32.mrf.mxu0 }
 0x140   : > { %703 = vmatprep.mubr.bf16.mxu1 %v521_v9  ;;  %v454_v15 = vadd.f32 %v453_v11, %v1551_v0 }
 0x141   : > { %v455_v12 = vpop.f32.mrf.mxu0  ;;  %704 = vmatmul.mubr.bf16.vlgmr.msra.gmra.mxu1 %v520_v10 }
 0x142   : > { %v456_v13 = vadd.f32 %v455_v12, %v1553_v1 }
 0x143   : > { %v457_v14 = vpop.f32.mrf.mxu0 }
 0x144   : > { %v458_v16 = vadd.f32 %v457_v14, %v1551_v0  ;;  %v522_v20 = vpack.c.bf16 %v456_v13, %v452_v17 }
 0x145   : > { %v461_v18 = vpop.f32.mrf.mxu0 }
 0x146   : > { %v523_v19 = vpack.c.bf16 %v458_v16, %v454_v15  ;;  %v462_v29 = vadd.f32 %v461_v18, %v1553_v1 }
 0x147   : > { %v463_v21 = vpop.f32.mrf.mxu0 }
 0x148   : > { %711 = vmatprep.mubr.bf16.mxu1 %v523_v19  ;;  %v464_v27 = vadd.f32 %v463_v21, %v1551_v0 }
 0x149   : > { %v465_v22 = vpop.f32.mrf.mxu0  ;;  %712 = vmatmul.mubr.bf16.gmra.mxu1 %v522_v20 }
 0x14a   : > { %v466_v23 = vadd.f32 %v465_v22, %v1553_v1 }
 0x14b   : > { %v467_v26 = vpop.f32.mrf.mxu0 }
 0x14c   : > { %v468_v28 = vadd.f32 %v467_v26, %v1551_v0  ;;  %v524_v38 = vpack.c.bf16 %v466_v23, %v462_v29 }
 0x14d   : > { %v471_v32 = vpop.f32.mrf.mxu0 }
 0x14e   : > { %v525_v35 = vpack.c.bf16 %v468_v28, %v464_v27  ;;  %v472_v53 = vadd.f32 %v471_v32, %v1553_v1 }
 0x14f   : > { %v473_v41 = vpop.f32.mrf.mxu0 }
 0x150   : > { %719 = vmatprep.mubr.bf16.mxu1 %v525_v35  ;;  %v474_v51 = vadd.f32 %v473_v41, %v1551_v0 }
 0x151   : > { %v475_v44 = vpop.f32.mrf.mxu0  ;;  %720 = vmatmul.mubr.bf16.gmra.mxu1 %v524_v38 }
 0x152   : > { %v476_v47 = vadd.f32 %v475_v44, %v1553_v1 }
 0x153   : > { %v477_v50 = vpop.f32.mrf.mxu0 }
 0x154   : > { %v478_v52 = vadd.f32 %v477_v50, %v1551_v0  ;;  %v526_v56 = vpack.c.bf16 %v476_v47, %v472_v53 }
 0x155   : > { %v481_v54 = vpop.f32.mrf.mxu0 }
 0x156   : > { %v527_v55 = vpack.c.bf16 %v478_v52, %v474_v51  ;;  %v482_v63 = vadd.f32 %v481_v54, %v1553_v1  ;;  %v1590_v51 = vld [vmem:[%s1697_s4] ss:$0 sm:$0xff] }
 0x157   : > { %v483_v57 = vpop.f32.mrf.mxu0 }
 0x158   : > { %727 = vmatprep.mubr.bf16.mxu1 %v527_v55  ;;  %v484_v61 = vadd.f32 %v483_v57, %v1551_v0 }
 0x159   : > { %v485_v58 = vpop.f32.mrf.mxu0  ;;  %728 = vmatmul.mubr.bf16.gmra.mxu1 %v526_v56 }
 0x15a   : > { %v486_v59 = vadd.f32 %v485_v58, %v1553_v1 }
 0x15b   : > { %v487_v60 = vpop.f32.mrf.mxu0 }
 0x15c   : > { %v488_v62 = vadd.f32 %v487_v60, %v1551_v0  ;;  %v528_v4 = vpack.c.bf16 %v486_v59, %v482_v63 }
 0x15d   : > { %v491_v2 = vpop.f32.mrf.mxu0 }
 0x15e   : > { %v529_v3 = vpack.c.bf16 %v488_v62, %v484_v61  ;;  %v492_v11 = vadd.f32 %v491_v2, %v1553_v1 }
 0x15f   : > { %v493_v5 = vpop.f32.mrf.mxu0 }
 0x160   : > { %735 = vmatprep.mubr.bf16.mxu1 %v529_v3  ;;  %v494_v9 = vadd.f32 %v493_v5, %v1551_v0 }
 0x161   : > { %v495_v6 = vpop.f32.mrf.mxu0  ;;  %736 = vmatmul.mubr.bf16.gmra.mxu1 %v528_v4 }
 0x162   : > { %v496_v7 = vadd.f32 %v495_v6, %v1553_v1 }
 0x163   : > { %v497_v8 = vpop.f32.mrf.mxu0 }
 0x164   : > { %v498_v10 = vadd.f32 %v497_v8, %v1551_v0  ;;  %v530_v14 = vpack.c.bf16 %v496_v7, %v492_v11 }
 0x165   : > { %v501_v12 = vpop.f32.mrf.mxu0 }
 0x166   : > { %v531_v13 = vpack.c.bf16 %v498_v10, %v494_v9  ;;  %v502_v21 = vadd.f32 %v501_v12, %v1553_v1 }
 0x167   : > { %v503_v15 = vpop.f32.mrf.mxu0 }
 0x168   : > { %743 = vmatprep.mubr.bf16.mxu1 %v531_v13  ;;  %v504_v19 = vadd.f32 %v503_v15, %v1551_v0 }
 0x169   : > { %v505_v16 = vpop.f32.mrf.mxu0  ;;  %744 = vmatmul.mubr.bf16.gmra.mxu1 %v530_v14 }
 0x16a   : > { %v506_v17 = vadd.f32 %v505_v16, %v1553_v1 }
 0x16b   : > { %v507_v18 = vpop.f32.mrf.mxu0 }
 0x16c   : > { %v508_v20 = vadd.f32 %v507_v18, %v1551_v0  ;;  %v532_v26 = vpack.c.bf16 %v506_v17, %v502_v21 }
 0x16d   : > { %v511_v22 = vpop.f32.mrf.mxu0 }
 0x16e   : > { %v533_v23 = vpack.c.bf16 %v508_v20, %v504_v19  ;;  %v512_v41 = vadd.f32 %v511_v22, %v1553_v1 }
 0x16f   : > { %v513_v27 = vpop.f32.mrf.mxu0 }
 0x170   : > { %751 = vmatprep.mubr.bf16.mxu1 %v533_v23  ;;  %v514_v35 = vadd.f32 %v513_v27, %v1551_v0 }
 0x171   : > { %v515_v28 = vpop.f32.mrf.mxu0  ;;  %752 = vmatmul.mubr.bf16.gmra.mxu1 %v532_v26 }
 0x172   : > { %v516_v29 = vadd.f32 %v515_v28, %v1553_v1 }
 0x173   : > { %v517_v32 = vpop.f32.mrf.mxu0 }
 0x174   : > { %v518_v38 = vadd.f32 %v517_v32, %v1551_v0  ;;  %v534_v47 = vpack.c.bf16 %v516_v29, %v512_v41 }
 0x176   : > { %v535_v44 = vpack.c.bf16 %v518_v38, %v514_v35 }
 0x178   : > { %759 = vmatprep.mubr.bf16.mxu1 %v535_v44 }
 0x179   : > { %760 = vmatmul.mubr.bf16.gmra.mxu1 %v534_v47 }
 0x201   : > { %v975_v50 = vpop.f32.mrf.mxu1 }
 0x203   : > { %v976_v52 = vpop.f32.mrf.mxu1 }
 0x204   : > { %v977_v53 = vadd.f32 %v976_v52, %v975_v50 }
 0x205   : > { %v978_v54 = vpop.f32.mrf.mxu1 }
 0x206   : > { %v706_v55 = vadd.f32 %v977_v53, %v1590_v51 }
 0x207   : > { %v979_v56 = vpop.f32.mrf.mxu1 }
 0x208   : > { %v768_v0 = vadd.f32 %v706_v55, %v1478_v24  ;;  %v980_v57 = vadd.f32 %v979_v56, %v978_v54 }
 0x209   : > { %v981_v1 = vpop.f32.mrf.mxu1 }
 0x20a   : > { %784 = vst [vmem:[%s1596_s14] sm:$0xff] %v768_v0  ;;  %v709_v58 = vadd.f32 %v980_v57, %v1590_v51 }
 0x20b   : > { %v982_v59 = vpop.f32.mrf.mxu1 }
 0x20c   : > { %v769_v60 = vadd.f32 %v709_v58, %v1481_v25  ;;  %v983_v61 = vadd.f32 %v982_v59, %v981_v1 }
 0x20d   : > { %v984_v62 = vpop.f32.mrf.mxu1 }
 0x20e   : > { %785 = vst [vmem:[%s1596_s14 + $0x8] sm:$0xff] %v769_v60  ;;  %v714_v24 = vadd.f32 %v983_v61, %v1590_v51 }
 0x20f   : > { %v985_v63 = vpop.f32.mrf.mxu1 }
 0x210   : > { %v770_v2 = vadd.f32 %v714_v24, %v1487_v30  ;;  %v986_v3 = vadd.f32 %v985_v63, %v984_v62 }
 0x211   : > { %v987_v4 = vpop.f32.mrf.mxu1 }
 0x212   : > { %786 = vst [vmem:[%s1596_s14 + $0x10] sm:$0xff] %v770_v2  ;;  %v717_v5 = vadd.f32 %v986_v3, %v1590_v51 }
 0x213   : > { %v988_v6 = vpop.f32.mrf.mxu1 }
 0x214   : > { %v771_v7 = vadd.f32 %v717_v5, %v1490_v31  ;;  %v989_v8 = vadd.f32 %v988_v6, %v987_v4 }
 0x215   : > { %v990_v25 = vpop.f32.mrf.mxu1 }
 0x216   : > { %787 = vst [vmem:[%s1596_s14 + $0x18] sm:$0xff] %v771_v7  ;;  %v722_v9 = vadd.f32 %v989_v8, %v1590_v51 }
 0x217   : > { %v991_v10 = vpop.f32.mrf.mxu1 }
 0x218   : > { %v772_v11 = vadd.f32 %v722_v9, %v1496_v33  ;;  %v992_v12 = vadd.f32 %v991_v10, %v990_v25 }
 0x219   : > { %v993_v30 = vpop.f32.mrf.mxu1 }
 0x21a   : > { %788 = vst [vmem:[%s1596_s14 + $0x20] sm:$0xff] %v772_v11  ;;  %v725_v13 = vadd.f32 %v992_v12, %v1590_v51 }
 0x21b   : > { %v994_v14 = vpop.f32.mrf.mxu1 }
 0x21c   : > { %v773_v15 = vadd.f32 %v725_v13, %v1499_v34  ;;  %v995_v16 = vadd.f32 %v994_v14, %v993_v30 }
 0x21d   : > { %v996_v31 = vpop.f32.mrf.mxu1 }
 0x21e   : > { %789 = vst [vmem:[%s1596_s14 + $0x28] sm:$0xff] %v773_v15  ;;  %v730_v17 = vadd.f32 %v995_v16, %v1590_v51 }
 0x21f   : > { %v997_v18 = vpop.f32.mrf.mxu1 }
 0x220   : > { %v774_v19 = vadd.f32 %v730_v17, %v1505_v36  ;;  %v998_v20 = vadd.f32 %v997_v18, %v996_v31 }
 0x221   : > { %v999_v33 = vpop.f32.mrf.mxu1 }
 0x222   : > { %790 = vst [vmem:[%s1596_s14 + $0x30] sm:$0xff] %v774_v19  ;;  %v733_v21 = vadd.f32 %v998_v20, %v1590_v51 }
 0x223   : > { %v1000_v22 = vpop.f32.mrf.mxu1 }
 0x224   : > { %v775_v23 = vadd.f32 %v733_v21, %v1508_v37  ;;  %v1001_v26 = vadd.f32 %v1000_v22, %v999_v33 }
 0x225   : > { %v1002_v34 = vpop.f32.mrf.mxu1 }
 0x226   : > { %791 = vst [vmem:[%s1596_s14 + $0x38] sm:$0xff] %v775_v23  ;;  %v738_v27 = vadd.f32 %v1001_v26, %v1590_v51 }
 0x227   : > { %v1003_v28 = vpop.f32.mrf.mxu1 }
 0x228   : > { %v776_v29 = vadd.f32 %v738_v27, %v1514_v39  ;;  %v1004_v32 = vadd.f32 %v1003_v28, %v1002_v34 }
 0x229   : > { %v1005_v36 = vpop.f32.mrf.mxu1 }
 0x22a   : > { %792 = vst [vmem:[%s1596_s14 + $0x40] sm:$0xff] %v776_v29  ;;  %v741_v35 = vadd.f32 %v1004_v32, %v1590_v51 }
 0x22b   : > { %v1006_v38 = vpop.f32.mrf.mxu1 }
 0x22c   : > { %v777_v41 = vadd.f32 %v741_v35, %v1517_v40  ;;  %v1007_v44 = vadd.f32 %v1006_v38, %v1005_v36 }
 0x22d   : > { %v1008_v37 = vpop.f32.mrf.mxu1 }
 0x22e   : > { %793 = vst [vmem:[%s1596_s14 + $0x48] sm:$0xff] %v777_v41  ;;  %v746_v47 = vadd.f32 %v1007_v44, %v1590_v51 }
 0x22f   : > { %v1009_v50 = vpop.f32.mrf.mxu1 }
 0x230   : > { %v778_v52 = vadd.f32 %v746_v47, %v1523_v42  ;;  %v1010_v53 = vadd.f32 %v1009_v50, %v1008_v37 }
 0x231   : > { %v1011_v39 = vpop.f32.mrf.mxu1 }
 0x232   : > { %794 = vst [vmem:[%s1596_s14 + $0x50] sm:$0xff] %v778_v52  ;;  %v749_v54 = vadd.f32 %v1010_v53, %v1590_v51 }
 0x233   : > { %v1012_v55 = vpop.f32.mrf.mxu1 }
 0x234   : > { %v779_v56 = vadd.f32 %v749_v54, %v1526_v43  ;;  %v1013_v0 = vadd.f32 %v1012_v55, %v1011_v39 }
 0x235   : > { %v1014_v40 = vpop.f32.mrf.mxu1 }
 0x236   : > { %795 = vst [vmem:[%s1596_s14 + $0x58] sm:$0xff] %v779_v56  ;;  %v754_v57 = vadd.f32 %v1013_v0, %v1590_v51 }
 0x237   : > { %v1015_v1 = vpop.f32.mrf.mxu1 }
 0x238   : > { %v780_v58 = vadd.f32 %v754_v57, %v1532_v45  ;;  %v1016_v42 = vadd.f32 %v1015_v1, %v1014_v40 }
 0x239   : > { %v1017_v59 = vpop.f32.mrf.mxu1 }
 0x23a   : > { %796 = vst [vmem:[%s1596_s14 + $0x60] sm:$0xff] %v780_v58  ;;  %v757_v60 = vadd.f32 %v1016_v42, %v1590_v51 }
 0x23b   : > { %v1018_v61 = vpop.f32.mrf.mxu1 }
 0x23c   : > { %v781_v43 = vadd.f32 %v757_v60, %v1535_v46  ;;  %v1019_v62 = vadd.f32 %v1018_v61, %v1017_v59 }
 0x23d   : > { %v1020_v24 = vpop.f32.mrf.mxu1 }
 0x23e   : > { %797 = vst [vmem:[%s1596_s14 + $0x68] sm:$0xff] %v781_v43  ;;  %v762_v63 = vadd.f32 %v1019_v62, %v1590_v51 }
 0x23f   : > { %v1021_v2 = vpop.f32.mrf.mxu1 }
 0x240   : > { %v782_v45 = vadd.f32 %v762_v63, %v1541_v48  ;;  %v1022_v3 = vadd.f32 %v1021_v2, %v1020_v24 }
 0x242   : > { %798 = vst [vmem:[%s1596_s14 + $0x70] sm:$0xff] %v782_v45  ;;  %v765_v4 = vadd.f32 %v1022_v3, %v1590_v51 }
 0x244   : > { %v783_v46 = vadd.f32 %v765_v4, %v1544_v49 }
 0x246   : > { %799 = vst [vmem:[%s1596_s14 + $0x78] sm:$0xff] %v783_v46 }
 0x247   : > { %1230 = shalt.err (!%p1227_p5)
}
 0x248   : > { %s1231_s15 = scalar_lea.hbm %s1647_s13, 2048  ;;  %s1235_s9 = scalar_lea.hbm %s1698_s5, 8192 }
 0x249   : > { %p1232_p10 = scmp.ne.s32.totalorder %s1647_s13, %s1231_s15  ;;  %p1236_p4 = scmp.lt.s32.totalorder %s1647_s13, %s1698_s5 }
 0x24a   : > { %p1237_p6 = scmp.lt.s32.totalorder %s1235_s9, %s1231_s15 }
 0x24b   : > { %p1233_p9 = pnand %p1232_p10, %p1715_p2 }
 0x24c   : > { %p1238_p8 = por %p1237_p6, %p1236_p4 }
 0x24d   : > { %p1234_p1 = pneg %p1233_p9 }
 0x24f   : > { %p1239_p0 = pnand %p1238_p8, %p1234_p1 }
 0x251   : > { %1242 = shalt.err (!%p1239_p0)
}
 0x252   : > { %s1296_s16 = smov 128   ;;  %s1297_s11 = smov 8  }
 0x253   : > { %1033 = dma.vmem_to_hbm [thread:$0]  (%p1715_p2), %s1649_s10, 2048, %s1647_s13, %s801_s27, %s1296_s16, %s1296_s16, %s1297_s11  }
 0x254 PF: > { %p1055_p7 = scmp.ge.s32.totalorder %s1285_s21, 2  ;;  %s829_s29 = sand.u32 1, %s1273_s18  }
 0x255   : > { %p1716_p11 = scmp.ne.s32.totalorder %s1705_s25, 0  ;;  %s830_s23 = scalar_lea.sflag [#allocation4], %s829_s29 }
 0x257   : > { %p1047_p12 = pnand %p1055_p7, %p1716_p11 }
 0x259   : > { %p1048_p13 = pneg %p1047_p12 }
 0x25b   : > { %1268 = dma.done.wait (%p1048_p13), %s830_s23, 2048  }
 0x25c   : > { %1270 = vsyncadd (%p1048_p13), %s830_s23, 4294965248  ;;  %p19_p3 = scmp.ge.s32.totalorder %s1402_s17, 6   ;;  %s1717_s18 = smov %s1277_s19 }
 0x25d   : > { %s1718_s19 = smov %s1281_s20  ;;  %s1719_s20 = smov %s1411_s28 }
 0x25e   : > { %s1720_s21 = smov %s1402_s17  ;;  %21 = sbr.rel (!%p19_p3) target bundleno = 6 (0x6), region = 93 }
 0x263   :  { %835 = vsyncpa [#allocation3], 1 }
 0x264   :  { %837 = vsyncpa [#allocation3 + $0x1], 1 }
 0x265   :  { %838 = vsyncpa [#allocation6], 1 }
 0x266   :  { %839 = vsyncpa [#allocation4], 1 }
 0x267   :  { %841 = vsyncpa [#allocation4 + $0x1], 1 }

</bundles_post_ra>
